<compile_context>
chip_gen: v7x
topology: tpu7x:2x2x1
jax: 0.10.0
libtpu: 0.0.40
codegen_flags: <defaults>
</compile_context>

<pallas_src>
import math
from functools import partial

import jax
import jax.numpy as jnp
from jax.experimental import pallas as pl
from jax.experimental.pallas import tpu as pltpu


def make_positional_encoding_table(max_len, d_model, dtype=jnp.float32):
    """Sinusoidal PE buffer, identical to the PyTorch register_buffer."""
    position = jnp.arange(max_len, dtype=jnp.float32)[:, None]            # (L, 1)
    div_term = jnp.exp(jnp.arange(0, d_model, 2, dtype=jnp.float32)
                       * (-math.log(10000.0) / d_model))                  # (D/2,)
    angles = position * div_term                                          # (L, D/2)
    pe = jnp.zeros((max_len, d_model), jnp.float32)
    pe = pe.at[:, 0::2].set(jnp.sin(angles))
    pe = pe.at[:, 1::2].set(jnp.cos(angles))
    return pe.astype(dtype)


def _pe_add_kernel(x_ref, pe_ref, o_ref):
    # x_ref: (B, tile) slab; pe_ref: (1, tile) PE chunk already in x's dtype.
    # Broadcast add over the batch (sublane) axis; pure VPU, lane-dense store.
    o_ref[...] = x_ref[...] + pe_ref[...]
    # TODO(synk): training-mode dropout would use pltpu.prng_seed +
    # pltpu.stateful_bernoulli here; eval mode is the identity.


@partial(jax.jit, static_argnames=("block_bytes",))
def positional_encoding(x, pe, *, block_bytes=2 << 20):
    """x: (B, S, D); pe: (max_len, D) precomputed buffer.  Returns x + pe[:S]."""
    B, S, D = x.shape
    if S > pe.shape[0]:
        raise ValueError(
            f"sequence length {S} exceeds PE table max_len {pe.shape[0]}")

    L = S * D
    itemsize = jnp.dtype(x.dtype).itemsize

    # Lane-dense 2D views (free reshapes of contiguous arrays); pe cast once.
    x2d = x.reshape(B, L)
    pe2d = pe[:S].astype(x.dtype).reshape(1, L)

    # Byte-budgeted tile along the flattened axis: ~block_bytes per x block,
    # a multiple of 128 lanes (min 128), clamped to the full extent.  Ragged
    # last tile is handled by pl.cdiv + Pallas masking.
    tile = max(128, (block_bytes // (B * itemsize)) // 128 * 128)
    if tile >= L:
        tile = L                      # full extent: always a legal block dim
    num_t = pl.cdiv(L, tile)

    cost = pl.CostEstimate(
        flops=B * L,                                    # one add per element
        transcendentals=0,
        bytes_accessed=(2 * B * L + L) * itemsize,      # x in, out, pe
    )

    out2d = pl.pallas_call(
        _pe_add_kernel,
        out_shape=jax.ShapeDtypeStruct((B, L), x.dtype),
        grid=(num_t,),
        in_specs=[
            pl.BlockSpec((B, tile), lambda t: (0, t)),   # x slab
            pl.BlockSpec((1, tile), lambda t: (0, t)),   # pe chunk
        ],
        out_specs=pl.BlockSpec((B, tile), lambda t: (0, t)),
        compiler_params=pltpu.CompilerParams(
            dimension_semantics=("parallel",),
            vmem_limit_bytes=32 << 20,      # explicit: > v5e's 16 MiB default,
        ),                                  # well under v7x's 64 MiB physical
        cost_estimate=cost,
        # TODO(synk): pass input_output_aliases={0: 0} when the caller donates
        # x (avoids a second (B,S,D) HBM allocation at production sizes).
    )(x2d, pe2d)

    return out2d.reshape(B, S, D)


if __name__ == "__main__":
    B, S, D = 2, 8, 32            # batch=2, seq=8, d_model=32
    MAX_LEN = 5000                # same default as the PyTorch module
    DROPOUT_P = 0.1               # eval mode -> identity (unused)

    x = jax.random.normal(jax.random.PRNGKey(0), (B, S, D), jnp.float32)
    pe = make_positional_encoding_table(MAX_LEN, D)

    out = positional_encoding(x, pe)
    jax.block_until_ready(out)

    ref = x + pe[None, :S, :].astype(x.dtype)
    assert out.shape == (B, S, D) and out.dtype == x.dtype
    assert bool(jnp.all(jnp.isfinite(out)))
    assert bool(jnp.allclose(out, ref, atol=1e-6, rtol=1e-6))
    print("KERNEL_OK")
</pallas_src>

<mosaic_0001>
module attributes {stable_mosaic.version = 11 : i64} {
  func.func @_pe_add_kernel(%arg0: i32, %arg1: memref<2x256xf32, #tpu.memory_space<vmem>>, %arg2: memref<1x256xf32, #tpu.memory_space<vmem>>, %arg3: memref<2x256xf32, #tpu.memory_space<vmem>>) attributes {dimension_semantics = [#tpu.dimension_semantics<parallel>], iteration_bounds = array<i64: 1>, scalar_prefetch = 0 : i64, scratch_operands = 0 : i64, tpu.core_type = #tpu.core_type<tc>, window_params = [{transform_indices = @transform_0, window_bounds = array<i64: 2, 256>}, {transform_indices = @transform_1, window_bounds = array<i64: 1, 256>}, {transform_indices = @transform_2, window_bounds = array<i64: 2, 256>}]} {
    %c0 = arith.constant 0 : index
    %c0_0 = arith.constant 0 : index
    %0 = vector.load %arg1[%c0, %c0_0] : memref<2x256xf32, #tpu.memory_space<vmem>>, vector<2x256xf32>
    %c0_1 = arith.constant 0 : index
    %c0_2 = arith.constant 0 : index
    %1 = vector.load %arg2[%c0_1, %c0_2] : memref<1x256xf32, #tpu.memory_space<vmem>>, vector<1x256xf32>
    %2 = vector.broadcast %1 : vector<1x256xf32> to vector<2x256xf32>
    %3 = arith.addf %0, %2 : vector<2x256xf32>
    %c0_3 = arith.constant 0 : index
    %c0_4 = arith.constant 0 : index
    %4 = vector.load %arg3[%c0_3, %c0_4] : memref<2x256xf32, #tpu.memory_space<vmem>>, vector<2x256xf32>
    tpu.vector_store %arg3[%c0_3, %c0_4], %3 {strides = array<i32>} : memref<2x256xf32, #tpu.memory_space<vmem>>, vector<2x256xf32>,
    return
  }
  func.func @transform_0(%arg0: i32) -> (i32, i32) {
    %c0_i32 = arith.constant 0 : i32
    %c0_i32_0 = arith.constant 0 : i32
    return %c0_i32, %arg0 : i32, i32
  }
  func.func @transform_1(%arg0: i32) -> (i32, i32) {
    %c0_i32 = arith.constant 0 : i32
    %c0_i32_0 = arith.constant 0 : i32
    return %c0_i32, %arg0 : i32, i32
  }
  func.func @transform_2(%arg0: i32) -> (i32, i32) {
    %c0_i32 = arith.constant 0 : i32
    %c0_i32_0 = arith.constant 0 : i32
    return %c0_i32, %arg0 : i32, i32
  }
}

</mosaic_0001>

<bundles_post_ra>
// kernel: positional_encoding.1
= control target key start
LH: loop header
LB: loop body
LE: loop exit
PB: predicated region body
PF: predicated region fallthrough
CT: control target
= control target key end

     0   :  { %v14_v0 = vlaneseq  ;;  %v38_v1 = vmov 1983009808   ;;  %s63_s1 = inlined_call_operand.vmem [shape: f32[1,256], index: 1, kind: input, shape index: {}]   ;;  %s64_s0 = inlined_call_operand.vmem [shape: f32[2,256], index: 0, kind: input, shape index: {}]   ;;  %s65_s2 = inlined_call_operand.vmem [shape: f32[2,256], index: 2, kind: output, shape index: {}]  }
   0x1   :  { %v24_v2 = vunpack.c.l.s4 %v38_v1  ;;  %v12_v4 = vld [vmem:[%s63_s1] sm:$0x3] }
   0x2   :  { %v15_v3 = vshrl.u32 %v14_v0, 7  ;;  %v11_v12 = vld [vmem:[%s64_s0] sm:$0xf] }
   0x3   :  { %v25_v5 = vunpack.c.0.s8 %v24_v2 }
   0x4   :  { %v16_v6 = vsub.s32 0, %v15_v3  ;;  %v20_v7 = vsub.s32 1, %v15_v3 }
   0x5   :  { %v28_v10 = vsub.s32 %v25_v5, %v15_v3 }
   0x6   :  { %v17_v8 = vrot.slane %v12_v4, %v16_v6  ;;  %v21_v9 = vrot.slane %v12_v4, %v20_v7 }
   0x8   :  { %v22_v11 = vcombine.low %v17_v8, %v21_v9 }
   0xa   :  { %v29_v13 = vrot.slane %v22_v11, %v28_v10 }
   0xc   :  { %v31_v14 = vadd.f32 %v29_v13, %v11_v12 }
   0xe   :  { %32 = vst [vmem:[%s65_s2] sm:$0xf] %v31_v14 }

</bundles_post_ra>
